<compile_context>
chip_gen: v6e
topology: v6e:2x2x1
jax: 0.10.0
libtpu: 0.0.40
codegen_flags: <defaults>
</compile_context>

<pallas_src>
import functools

import jax
import jax.numpy as jnp
from jax.experimental import pallas as pl
from jax.experimental.pallas import tpu as pltpu


_LANE = 128
_SUBLANE_BF16 = 16
_VMEM_BUDGET = 40 * 1024 * 1024       # conservative per-TC budget (v7x: 64 MiB physical)
_VMEM_LIMIT_CAP = 48 * 1024 * 1024


def _round_up(x: int, m: int) -> int:
    return ((x + m - 1) // m) * m


# ---------------------------------------------------------------------------
# Kernel: one row-tile through the full (statically unrolled) layer stack.
# refs = (x_ref, w_0..w_{L-1}, b_0..b_{L-1}, o_ref)
# ---------------------------------------------------------------------------
def _ffn_fused_kernel(*refs, n_layers: int):
    x_ref = refs[0]
    w_refs = refs[1:1 + n_layers]
    b_refs = refs[1 + n_layers:1 + 2 * n_layers]
    o_ref = refs[1 + 2 * n_layers]

    h = x_ref[...]                                   # (TM, in_dim) bf16
    for li in range(n_layers):
        w = w_refs[li][...]                          # (K, N) bf16, VMEM resident
        b = b_refs[li][...]                          # (1, N) f32
        y = jnp.dot(h, w, preferred_element_type=jnp.float32) + b
        if li < n_layers - 1:
            h = jnp.maximum(y, 0.0).astype(jnp.bfloat16)   # ReLU, back to bf16 for MXU
        else:
            h = y                                          # final layer stays f32
    o_ref[...] = h.astype(o_ref.dtype)


# ---------------------------------------------------------------------------
# Row-tile planning against a per-TensorCore VMEM budget.
# ---------------------------------------------------------------------------
def _plan_tiles(m: int, layer_shapes):
    """Return (tm, estimated_vmem_bytes)."""
    in_dim = layer_shapes[0][0]
    out_dim = layer_shapes[-1][1]
    max_n = max(n for _, n in layer_shapes)

    # Resident params: Pallas still allocates 2 buffers per operand, so budget 2x.
    param_bytes = 2 * sum(k * n * 2 + n * 4 for k, n in layer_shapes)
    if param_bytes > _VMEM_BUDGET // 2:
        # TODO(synk): add an N/K-tiled multi-pass fallback (extra grid axes) for
        # weight stacks that do not fit VMEM, instead of requiring residency.
        raise ValueError(
            f"FFN weight stack ({param_bytes / 2**20:.1f} MiB double-buffered) "
            f"exceeds the per-TensorCore VMEM budget "
            f"({_VMEM_BUDGET / 2**20:.0f} MiB).")

    def footprint(tm):
        io = 2 * tm * in_dim * 2 + 2 * tm * out_dim * 4   # double-buffered x / out tiles
        act = 3 * tm * max_n * 4                          # live intermediates + slack
        return param_bytes + io + act

    tm = min(2048, _round_up(max(m, 1), _SUBLANE_BF16))
    if m >= 2 * _SUBLANE_BF16:
        # Keep >= 2 grid steps so dimension_semantics=("parallel",) can shard
        # the row axis across both v7x TensorCores.
        tm = min(tm, _round_up(pl.cdiv(m, 2), _SUBLANE_BF16))
    while footprint(tm) > _VMEM_BUDGET:
        if tm <= _SUBLANE_BF16:
            raise ValueError("activation tile does not fit VMEM even at TM=16; "
                             "the layer N/K dims must be tiled instead.")
        tm = _round_up(tm // 2, _SUBLANE_BF16)
    return tm, footprint(tm)


# ---------------------------------------------------------------------------
# Wrapper: single fused pallas_call over an M-tiled grid.
# ---------------------------------------------------------------------------
def ffn_forward(x, weights, biases, out_dim: int):
    lead_shape = x.shape[:-1]
    in_dim = x.shape[-1]
    out_dtype = x.dtype if jnp.issubdtype(x.dtype, jnp.floating) else jnp.float32

    x2d = x.reshape(-1, in_dim)
    m = x2d.shape[0]
    # bf16 operands into the MXU; cast once here (ideally the caller keeps
    # activations bf16 end-to-end so this cast fuses upstream / disappears).
    if x2d.dtype != jnp.bfloat16:
        x2d = x2d.astype(jnp.bfloat16)

    n_layers = len(weights)
    layer_shapes = [tuple(w.shape) for w in weights]
    assert layer_shapes[0][0] == in_dim, (layer_shapes[0], in_dim)

    tm, est_vmem = _plan_tiles(m, layer_shapes)
    grid = (pl.cdiv(m, tm),)          # partial final block is fine (rows independent)

    in_specs = [pl.BlockSpec((tm, in_dim), lambda i: (i, 0))]
    for w in weights:                 # full-array blocks, constant index -> VMEM resident
        in_specs.append(pl.BlockSpec(w.shape, lambda i: (0, 0)))
    for b in biases:
        in_specs.append(pl.BlockSpec(b.shape, lambda i: (0, 0)))
    out_spec = pl.BlockSpec((tm, out_dim), lambda i: (i, 0))

    flops = 2 * m * sum(k * n for k, n in layer_shapes)
    bytes_accessed = (m * in_dim * 2
                      + sum(k * n * 2 + n * 4 for k, n in layer_shapes)
                      + m * out_dim * jnp.dtype(out_dtype).itemsize)
    vmem_limit = int(min(max(2 * est_vmem, 16 * 1024 * 1024), _VMEM_LIMIT_CAP))

    kernel = functools.partial(_ffn_fused_kernel, n_layers=n_layers)
    out = pl.pallas_call(
        kernel,
        out_shape=jax.ShapeDtypeStruct((m, out_dim), out_dtype),
        grid=grid,
        in_specs=in_specs,
        out_specs=out_spec,
        compiler_params=pltpu.CompilerParams(
            dimension_semantics=("parallel",),     # rows independent -> 2 TCs on v7x
            vmem_limit_bytes=vmem_limit,
        ),
        cost_estimate=pl.CostEstimate(
            flops=int(flops), transcendentals=0, bytes_accessed=int(bytes_accessed)),
    )(x2d, *weights, *biases)

    return out.reshape(*lead_shape, out_dim)


# ---------------------------------------------------------------------------
# Module: JAX/Pallas port of the PyTorch FFN.
# ---------------------------------------------------------------------------
class FFN:
    """Linear(input->h0) -> ReLU -> ... -> Linear(h_last->output), one fused kernel."""

    def __init__(self, input_dim, output_dim, hidden_layers=None, key=None):
        if hidden_layers is None:
            hidden_layers = []
        if key is None:
            key = jax.random.PRNGKey(0)
        dims = [input_dim] + list(hidden_layers) + [output_dim]
        self.input_dim, self.output_dim = input_dim, output_dim

        # Kernel feature dims:
        #  * layer 0 keeps K = input_dim (matches the unpadded x block),
        #  * hidden dims are padded to 128 lanes (zero weight columns / bias
        #    lanes are inert through Linear + ReLU),
        #  * the final layer keeps N = output_dim (narrow, unamplified store).
        # (On v6e, hidden dims >= 256 would ideally round to multiples of 256
        #  to fill the 256x256 MXU; moot at these HBM-bound widths.)
        pad = [dims[0]] + [_round_up(d, _LANE) for d in dims[1:-1]] + [dims[-1]]

        self.params_raw = []   # unpadded f32 reference parameters
        self.weights = []      # bf16 kernel layout (K_pad, N_pad)
        self.biases = []       # f32 (1, N_pad)
        for i in range(len(dims) - 1):
            fan_in, fan_out = dims[i], dims[i + 1]
            key, kw, kb = jax.random.split(key, 3)
            bound = 1.0 / (fan_in ** 0.5)         # nn.Linear default init
            w = jax.random.uniform(kw, (fan_in, fan_out), jnp.float32,
                                   minval=-bound, maxval=bound)
            b = jax.random.uniform(kb, (fan_out,), jnp.float32,
                                   minval=-bound, maxval=bound)
            self.params_raw.append((w, b))
            w_pad = jnp.pad(w, ((0, pad[i] - fan_in), (0, pad[i + 1] - fan_out)))
            b_pad = jnp.pad(b, (0, pad[i + 1] - fan_out)).reshape(1, -1)
            self.weights.append(w_pad.astype(jnp.bfloat16))
            self.biases.append(b_pad.astype(jnp.float32))

    def __call__(self, x):
        return ffn_forward(x, self.weights, self.biases, self.output_dim)


# ---------------------------------------------------------------------------
# Pure-jnp reference (emulates bf16 operands + f32 accumulation).
# ---------------------------------------------------------------------------
def _ffn_ref(params_raw, x):
    lead_shape = x.shape[:-1]
    y = x.reshape(-1, x.shape[-1]).astype(jnp.float32)
    n = len(params_raw)
    for li, (w, b) in enumerate(params_raw):
        y_b = y.astype(jnp.bfloat16).astype(jnp.float32)
        w_b = w.astype(jnp.bfloat16).astype(jnp.float32)
        y = y_b @ w_b + b
        if li < n - 1:
            y = jnp.maximum(y, 0.0)
    return y.reshape(*lead_shape, y.shape[-1])


if __name__ == "__main__":
    key = jax.random.PRNGKey(0)
    k1, k2, k3, kp = jax.random.split(key, 4)

    input_dim, output_dim = 32, 16
    hidden_layers = [64, 48]
    ffn = FFN(input_dim, output_dim, hidden_layers, key=kp)

    # Small case: (2, 8, 32) -> (2, 8, 16), single grid step.
    x = jax.random.normal(k1, (2, 8, input_dim), jnp.float32)
    out = jax.block_until_ready(ffn(x))
    ref = _ffn_ref(ffn.params_raw, x)
    assert out.shape == (2, 8, output_dim), out.shape
    assert out.dtype == jnp.float32, out.dtype
    assert jnp.allclose(out, ref, atol=2e-3, rtol=2e-3), "mismatch (small case)"

    # Larger case: 1024 rows -> 2 parallel grid steps (both v7x TensorCores).
    x2 = jax.random.normal(k2, (4, 256, input_dim), jnp.float32)
    out2 = jax.block_until_ready(ffn(x2))
    ref2 = _ffn_ref(ffn.params_raw, x2)
    assert out2.shape == (4, 256, output_dim), out2.shape
    assert jnp.allclose(out2, ref2, atol=2e-3, rtol=2e-3), "mismatch (tiled case)"

    # Ragged case: 300 rows, tile of 160 -> partial final block path.
    x3 = jax.random.normal(k3, (3, 100, input_dim), jnp.float32)
    out3 = jax.block_until_ready(ffn(x3))
    ref3 = _ffn_ref(ffn.params_raw, x3)
    assert out3.shape == (3, 100, output_dim), out3.shape
    assert jnp.allclose(out3, ref3, atol=2e-3, rtol=2e-3), "mismatch (ragged case)"

    print("KERNEL_OK")
</pallas_src>

<mosaic_0001>
module attributes {stable_mosaic.version = 11 : i64} {
  func.func @_ffn_fused_kernel(%arg0: i32, %arg1: memref<16x32xbf16, #tpu.memory_space<vmem>>, %arg2: memref<32x128xbf16, #tpu.memory_space<vmem>>, %arg3: memref<128x128xbf16, #tpu.memory_space<vmem>>, %arg4: memref<128x16xbf16, #tpu.memory_space<vmem>>, %arg5: memref<1x128xf32, #tpu.memory_space<vmem>>, %arg6: memref<1x128xf32, #tpu.memory_space<vmem>>, %arg7: memref<1x16xf32, #tpu.memory_space<vmem>>, %arg8: memref<16x16xf32, #tpu.memory_space<vmem>>) attributes {dimension_semantics = [#tpu.dimension_semantics<parallel>], iteration_bounds = array<i64: 1>, scalar_prefetch = 0 : i64, scratch_operands = 0 : i64, tpu.core_type = #tpu.core_type<tc>, window_params = [{transform_indices = @transform_0, window_bounds = array<i64: 16, 32>}, {pipeline_mode = #tpu.pipeline_mode<synchronous>, transform_indices = @transform_1, window_bounds = array<i64: 32, 128>}, {pipeline_mode = #tpu.pipeline_mode<synchronous>, transform_indices = @transform_2, window_bounds = array<i64: 128, 128>}, {pipeline_mode = #tpu.pipeline_mode<synchronous>, transform_indices = @transform_3, window_bounds = array<i64: 128, 16>}, {pipeline_mode = #tpu.pipeline_mode<synchronous>, transform_indices = @transform_4, window_bounds = array<i64: 1, 128>}, {pipeline_mode = #tpu.pipeline_mode<synchronous>, transform_indices = @transform_5, window_bounds = array<i64: 1, 128>}, {pipeline_mode = #tpu.pipeline_mode<synchronous>, transform_indices = @transform_6, window_bounds = array<i64: 1, 16>}, {transform_indices = @transform_7, window_bounds = array<i64: 16, 16>}]} {
    %c0 = arith.constant 0 : index
    %c0_0 = arith.constant 0 : index
    %0 = vector.load %arg1[%c0, %c0_0] : memref<16x32xbf16, #tpu.memory_space<vmem>>, vector<16x32xbf16>
    %c0_1 = arith.constant 0 : index
    %c0_2 = arith.constant 0 : index
    %1 = vector.load %arg2[%c0_1, %c0_2] : memref<32x128xbf16, #tpu.memory_space<vmem>>, vector<32x128xbf16>
    %c0_3 = arith.constant 0 : index
    %c0_4 = arith.constant 0 : index
    %2 = vector.load %arg5[%c0_3, %c0_4] : memref<1x128xf32, #tpu.memory_space<vmem>>, vector<1x128xf32>
    %cst = arith.constant dense<0.000000e+00> : vector<16x128xf32>
    %3 = tpu.matmul %0, %1, %cst {dimension_numbers = #tpu.dot_dimension_numbers<[1], [0], [0], [1], [0, 0, 1, 1], [], []>} : vector<16x32xbf16>, vector<32x128xbf16>, vector<16x128xf32> -> vector<16x128xf32>
    %4 = vector.broadcast %2 : vector<1x128xf32> to vector<16x128xf32>
    %5 = arith.addf %3, %4 : vector<16x128xf32>
    %cst_5 = arith.constant 0.000000e+00 : f32
    %6 = vector.broadcast %cst_5 : f32 to vector<16x128xf32>
    %7 = arith.maximumf %5, %6 : vector<16x128xf32>
    %8 = arith.truncf %7 : vector<16x128xf32> to vector<16x128xbf16>
    %c0_6 = arith.constant 0 : index
    %c0_7 = arith.constant 0 : index
    %9 = vector.load %arg3[%c0_6, %c0_7] : memref<128x128xbf16, #tpu.memory_space<vmem>>, vector<128x128xbf16>
    %c0_8 = arith.constant 0 : index
    %c0_9 = arith.constant 0 : index
    %10 = vector.load %arg6[%c0_8, %c0_9] : memref<1x128xf32, #tpu.memory_space<vmem>>, vector<1x128xf32>
    %cst_10 = arith.constant dense<0.000000e+00> : vector<16x128xf32>
    %11 = tpu.matmul %8, %9, %cst_10 {dimension_numbers = #tpu.dot_dimension_numbers<[1], [0], [0], [1], [0, 0, 1, 1], [], []>} : vector<16x128xbf16>, vector<128x128xbf16>, vector<16x128xf32> -> vector<16x128xf32>
    %12 = vector.broadcast %10 : vector<1x128xf32> to vector<16x128xf32>
    %13 = arith.addf %11, %12 : vector<16x128xf32>
    %cst_11 = arith.constant 0.000000e+00 : f32
    %14 = vector.broadcast %cst_11 : f32 to vector<16x128xf32>
    %15 = arith.maximumf %13, %14 : vector<16x128xf32>
    %16 = arith.truncf %15 : vector<16x128xf32> to vector<16x128xbf16>
    %c0_12 = arith.constant 0 : index
    %c0_13 = arith.constant 0 : index
    %17 = vector.load %arg4[%c0_12, %c0_13] : memref<128x16xbf16, #tpu.memory_space<vmem>>, vector<128x16xbf16>
    %c0_14 = arith.constant 0 : index
    %c0_15 = arith.constant 0 : index
    %18 = vector.load %arg7[%c0_14, %c0_15] : memref<1x16xf32, #tpu.memory_space<vmem>>, vector<1x16xf32>
    %cst_16 = arith.constant dense<0.000000e+00> : vector<16x16xf32>
    %19 = tpu.matmul %16, %17, %cst_16 {dimension_numbers = #tpu.dot_dimension_numbers<[1], [0], [0], [1], [0, 0, 1, 1], [], []>} : vector<16x128xbf16>, vector<128x16xbf16>, vector<16x16xf32> -> vector<16x16xf32>
    %20 = vector.broadcast %18 : vector<1x16xf32> to vector<16x16xf32>
    %21 = arith.addf %19, %20 : vector<16x16xf32>
    %c0_17 = arith.constant 0 : index
    %c0_18 = arith.constant 0 : index
    %22 = vector.load %arg8[%c0_17, %c0_18] : memref<16x16xf32, #tpu.memory_space<vmem>>, vector<16x16xf32>
    tpu.vector_store %arg8[%c0_17, %c0_18], %21 {strides = array<i32>} : memref<16x16xf32, #tpu.memory_space<vmem>>, vector<16x16xf32>,
    return
  }
  func.func @transform_0(%arg0: i32) -> (i32, i32) {
    %c0_i32 = arith.constant 0 : i32
    %c0_i32_0 = arith.constant 0 : i32
    return %arg0, %c0_i32 : i32, i32
  }
  func.func @transform_1(%arg0: i32) -> (i32, i32) {
    %c0_i32 = arith.constant 0 : i32
    %c0_i32_0 = arith.constant 0 : i32
    %c0_i32_1 = arith.constant 0 : i32
    return %c0_i32, %c0_i32_0 : i32, i32
  }
  func.func @transform_2(%arg0: i32) -> (i32, i32) {
    %c0_i32 = arith.constant 0 : i32
    %c0_i32_0 = arith.constant 0 : i32
    %c0_i32_1 = arith.constant 0 : i32
    return %c0_i32, %c0_i32_0 : i32, i32
  }
  func.func @transform_3(%arg0: i32) -> (i32, i32) {
    %c0_i32 = arith.constant 0 : i32
    %c0_i32_0 = arith.constant 0 : i32
    %c0_i32_1 = arith.constant 0 : i32
    return %c0_i32, %c0_i32_0 : i32, i32
  }
  func.func @transform_4(%arg0: i32) -> (i32, i32) {
    %c0_i32 = arith.constant 0 : i32
    %c0_i32_0 = arith.constant 0 : i32
    %c0_i32_1 = arith.constant 0 : i32
    return %c0_i32, %c0_i32_0 : i32, i32
  }
  func.func @transform_5(%arg0: i32) -> (i32, i32) {
    %c0_i32 = arith.constant 0 : i32
    %c0_i32_0 = arith.constant 0 : i32
    %c0_i32_1 = arith.constant 0 : i32
    return %c0_i32, %c0_i32_0 : i32, i32
  }
  func.func @transform_6(%arg0: i32) -> (i32, i32) {
    %c0_i32 = arith.constant 0 : i32
    %c0_i32_0 = arith.constant 0 : i32
    %c0_i32_1 = arith.constant 0 : i32
    return %c0_i32, %c0_i32_0 : i32, i32
  }
  func.func @transform_7(%arg0: i32) -> (i32, i32) {
    %c0_i32 = arith.constant 0 : i32
    %c0_i32_0 = arith.constant 0 : i32
    return %arg0, %c0_i32 : i32, i32
  }
}

</mosaic_0001>

<bundles_post_ra>
// kernel: tpu_custom_call.1
= control target key start
LH: loop header
LB: loop body
LE: loop exit
PB: predicated region body
PF: predicated region fallthrough
CT: control target
= control target key end

     0   :  { %12 = vsyncpa [#allocation3], 0  ;;  %s668_s0 = inlined_call_operand.vmem [shape: bf16[16,32], index: 0, kind: input, shape index: {}]   ;;  %s669_s1 = inlined_call_operand.hbm [shape: bf16[32,128], index: 1, kind: input, shape index: {}]   ;;  %s670_s2 = inlined_call_operand.vmem [shape: bf16[128,128], index: 2, kind: input, shape index: {}]   ;;  %s671_s3 = inlined_call_operand.vmem [shape: bf16[128,16], index: 3, kind: input, shape index: {}]   ;;  %s672_s4 = inlined_call_operand.vmem [shape: f32[1,128], index: 4, kind: input, shape index: {}]   ;;  %s673_s5 = inlined_call_operand.vmem [shape: f32[1,128], index: 5, kind: input, shape index: {}]   ;;  %s674_s6 = inlined_call_operand.vmem [shape: f32[1,16], index: 6, kind: input, shape index: {}]   ;;  %s675_s7 = inlined_call_operand.hbm [shape: f32[16,16], index: 7, kind: output, shape index: {}]  }
   0x1   :  { %13 = vsyncpa [#allocation4], 0  ;;  %s530_s24 = smov [#allocation2]  }
   0x2   :  { %s21_s25 = sshll.u32 %s530_s24, 4  ;;  %s22_s25 = int_to_ptr.vmem [resolvable:$true] %s21_s25 }
   0x3   :  { %s494_s26 = scalar_lea.vmem %s22_s25, 256  ;;  %p499_p1 = scmp.lt.s32.totalorder %s22_s25, %s22_s25 }
   0x4   :  { %p495_p0 = scmp.ne.s32.totalorder %s22_s25, %s494_s26  ;;  %p500_p2 = scmp.lt.s32.totalorder %s494_s26, %s494_s26 }
   0x6   :  { %p501_p3 = por %p500_p2, %p499_p1 }
   0x8   :  { %p502_p4 = pnand %p501_p3, %p495_p0 }
   0xa   :  { %505 = shalt.err (!%p502_p4)
}
   0xb   :  { %s531_s27 = smov 64   ;;  %s532_s28 = smov 4  }
   0xc   :  { %27 = dma.hbm_to_vmem [thread:$0]  %s669_s1, 256, %s22_s25, [#allocation3], %s531_s27, %s531_s27, %s532_s28  }
   0xd   :  { %526 = dma.done.wait [#allocation3], 256  }
   0xe   :  { %527 = vsyncadd [#allocation3], 4294967040  ;;  %v533_v0 = vmov 0.0   ;;  %vm534_vm0 = vmmov 0   ;;  %v467_v1 = vld [vmem:[#allocation2 + $0x8] sm:$0xff]   ;;  %v468_v2 = vld [vmem:[#allocation2] sm:$0xff]  }
   0xf   :  { %411 = vmatprep.subr.bf16.mxu0 %v533_v0  ;;  %415 = vmatprep.mubr.msk.bf16.mxu0 %vm534_vm0, %v533_v0  ;;  %v470_v3 = vld [vmem:[%s670_s2 + $0x38] sm:$0xff]   ;;  %v469_v4 = vld [vmem:[%s668_s0] sm:$0xff]   ;;  %v471_v5 = vld [vmem:[%s670_s2 + $0x30] sm:$0xff]   ;;  %vm72_vm1 = vcmask 261120   ;;  %vm347_vm2 = vcmask 130048  }
  0x10   :  { %419 = vmatprep.subr.bf16.mxu1 %v533_v0  ;;  %435 = vmatprep.mubr.msk.bf16.mxu1 %vm534_vm0, %v533_v0  ;;  %v472_v6 = vld [vmem:[%s670_s2 + $0x28] sm:$0xff]   ;;  %v473_v7 = vld [vmem:[%s670_s2 + $0x20] sm:$0xff]   ;;  %v474_v8 = vld [vmem:[%s670_s2 + $0x18] sm:$0xff]  }
  0x11   :  { %412 = vmatpush3.bf16.msra.mxu0 %v467_v1  ;;  %420 = vmatpush3.bf16.msra.mxu1 %v470_v3  ;;  %v475_v9 = vld [vmem:[%s670_s2 + $0x10] sm:$0xff]   ;;  %v476_v10 = vld [vmem:[%s670_s2 + $0x8] sm:$0xff]   ;;  %v477_v11 = vld [vmem:[%s670_s2] sm:$0xff]  }
  0x12   :  { %413 = vmatprep.subr.bf16.mxu0 %v533_v0  ;;  %421 = vmatprep.subr.bf16.mxu1 %v533_v0  ;;  %v478_v12 = vld [vmem:[%s671_s3 + $0x38] sm:$0xff]   ;;  %v479_v13 = vld [vmem:[%s671_s3 + $0x30] sm:$0xff]   ;;  %v480_v14 = vld [vmem:[%s671_s3 + $0x28] sm:$0xff]  }
  0x13   :  { %v481_v15 = vld [vmem:[%s671_s3 + $0x20] sm:$0xff]   ;;  %v482_v16 = vld [vmem:[%s671_s3 + $0x18] sm:$0xff]   ;;  %v483_v27 = vld [vmem:[%s671_s3 + $0x10] sm:$0xff]  }
  0x14   :  { %v367_v17 = vld [vmem:[%s672_s4] ss:$0 sm:$0xff]  ;;  %v484_v28 = vld [vmem:[%s671_s3 + $0x8] sm:$0xff]  }
  0x15   :  { %414 = vmatpush3.bf16.msra.mxu0 %v468_v2  ;;  %422 = vmatpush3.bf16.msra.mxu1 %v471_v5  ;;  %v485_v29 = vld [vmem:[%s671_s3] sm:$0xff]   ;;  %s535_s3 = smov [#allocation5]  }
  0x16   :  { %439 = vmatprep.subr.bf16.mxu0 %v533_v0  ;;  %423 = vmatprep.subr.bf16.mxu1 %v533_v0  ;;  %v372_v30 = vld [vmem:[%s673_s5] ss:$0 sm:$0xff]  ;;  %s355_s19 = sshll.u32 %s535_s3, 4  ;;  %s356_s19 = int_to_ptr.vmem [resolvable:$true] %s355_s19 }
  0x17   :  { %v381_v40 = vld [vmem:[%s674_s6] ss:$0 sm:$0xff]  ;;  %s506_s5 = scalar_lea.vmem %s356_s19, 256  ;;  %p511_p6 = scmp.lt.s32.totalorder %s356_s19, %s356_s19 }
  0x18   :  { %416 = vmatmul.mubr.msk.bf16.vlgmr.msra.gmra.mxu0 %vm72_vm1, %v469_v4  ;;  %p507_p5 = scmp.ne.s32.totalorder %s356_s19, %s506_s5  ;;  %p512_p7 = scmp.lt.s32.totalorder %s506_s5, %s506_s5 }
  0x19   :  { %455 = vmatprep.mubr.msk.bf16.mxu0 %vm534_vm0, %v533_v0  ;;  %424 = vmatpush3.bf16.msra.mxu1 %v472_v6 }
  0x1a   :  { %425 = vmatprep.subr.bf16.mxu1 %v533_v0  ;;  %440 = vmatpush3.bf16.msra.mxu0 %v478_v12  ;;  %p513_p8 = por %p512_p7, %p511_p6 }
  0x1b   :  { %441 = vmatprep.subr.bf16.mxu0 %v533_v0 }
  0x1c   :  { %p514_p9 = pnand %p513_p8, %p507_p5 }
  0x1d   :  { %426 = vmatpush3.bf16.msra.mxu1 %v473_v7 }
  0x1e   :  { %427 = vmatprep.subr.bf16.mxu1 %v533_v0  ;;  %442 = vmatpush3.bf16.msra.mxu0 %v479_v13 }
  0x1f   :  { %443 = vmatprep.subr.bf16.mxu0 %v533_v0 }
  0x21   :  { %428 = vmatpush3.bf16.msra.mxu1 %v474_v8 }
  0x22   :  { %429 = vmatprep.subr.bf16.mxu1 %v533_v0  ;;  %444 = vmatpush3.bf16.msra.mxu0 %v480_v14 }
  0x23   :  { %445 = vmatprep.subr.bf16.mxu0 %v533_v0 }
  0x25   :  { %430 = vmatpush3.bf16.msra.mxu1 %v475_v9 }
  0x26   :  { %431 = vmatprep.subr.bf16.mxu1 %v533_v0  ;;  %446 = vmatpush3.bf16.msra.mxu0 %v481_v15 }
  0x27   :  { %447 = vmatprep.subr.bf16.mxu0 %v533_v0 }
  0x29   :  { %432 = vmatpush3.bf16.msra.mxu1 %v476_v10 }
  0x2a   :  { %433 = vmatprep.subr.bf16.mxu1 %v533_v0  ;;  %448 = vmatpush3.bf16.msra.mxu0 %v482_v16 }
  0x2b   :  { %449 = vmatprep.subr.bf16.mxu0 %v533_v0 }
  0x2d   :  { %434 = vmatpush3.bf16.msra.mxu1 %v477_v11 }
  0x2e   :  { %450 = vmatpush3.bf16.msra.mxu0 %v483_v27 }
  0x2f   :  { %451 = vmatprep.subr.bf16.mxu0 %v533_v0 }
  0x32   :  { %452 = vmatpush3.bf16.msra.mxu0 %v484_v28 }
  0x33   :  { %453 = vmatprep.subr.bf16.mxu0 %v533_v0 }
  0x36   :  { %454 = vmatpush3.bf16.msra.mxu0 %v485_v29 }
  0xd8   :  { %v110_v18 = vpop.f32.mrf.mxu0 }
  0xd9   :  { %v111_v20 = vadd.f32 %v367_v17, %v110_v18 }
  0xda   :  { %v417_v19 = vpop.f32.mrf.mxu0 }
  0xdb   :  { %v117_v24 = vmax.f32 %v111_v20, 0.0 }
  0xdc   :  { %v113_v21 = vpop.f32.mrf.mxu0 }
  0xdd   :  { %v114_v22 = vadd.f32 %v367_v17, %v113_v21 }
  0xde   :  { %v418_v23 = vpop.f32.mrf.mxu0 }
  0xdf   :  { %v118_v25 = vmax.f32 %v114_v22, 0.0 }
  0xe1   :  { %v119_v26 = vpack.c.bf16 %v118_v25, %v117_v24 }
  0xe3   :  { %436 = vmatmul.mubr.bf16.vlgmr.msra.gmra.mxu1 %v119_v26 }
 0x1a3   :  { %v225_v31 = vpop.f32.mrf.mxu1 }
 0x1a4   :  { %v226_v33 = vadd.f32 %v372_v30, %v225_v31 }
 0x1a5   :  { %v437_v32 = vpop.f32.mrf.mxu1 }
 0x1a6   :  { %v232_v37 = vmax.f32 %v226_v33, 0.0 }
 0x1a7   :  { %v228_v34 = vpop.f32.mrf.mxu1 }
 0x1a8   :  { %v229_v35 = vadd.f32 %v372_v30, %v228_v34 }
 0x1a9   :  { %v438_v36 = vpop.f32.mrf.mxu1 }
 0x1aa   :  { %v233_v38 = vmax.f32 %v229_v35, 0.0 }
 0x1ac   :  { %v234_v39 = vpack.c.bf16 %v233_v38, %v232_v37 }
 0x1ae   :  { %456 = vmatmul.mubr.bf16.vlgmr.msra.gmra.mxu0 %v234_v39 }
 0x26e   :  { %v340_v41 = vpop.f32.mrf.mxu0 }
 0x26f   :  { %v341_v42 = vadd.f32 %v381_v40, %v340_v41 }
 0x270   :  { %v457_v43 = vpop.f32.mrf.mxu0 }
 0x271   :  { %348 = vst.msk [vmem:[#allocation5] sm:$0xff] %vm347_vm2, %v341_v42 }
 0x272   :  { %v343_v44 = vpop.f32.mrf.mxu0 }
 0x273   :  { %v344_v45 = vadd.f32 %v381_v40, %v343_v44 }
 0x274   :  { %v458_v46 = vpop.f32.mrf.mxu0 }
 0x275   :  { %349 = vst.msk [vmem:[#allocation5 + $0x8] sm:$0xff] %vm347_vm2, %v344_v45 }
 0x276   :  { %517 = shalt.err (!%p514_p9)
}
 0x277   :  { %s536_s6 = smov 128   ;;  %s537_s20 = smov 8  }
 0x278   :  { %361 = dma.vmem_to_hbm [thread:$0]  %s356_s19, 256, %s675_s7, [#allocation4], %s536_s6, %s536_s6, %s537_s20  }
 0x279   :  { %528 = dma.done.wait [#allocation4], 256  }
 0x27a   :  { %529 = vsyncadd [#allocation4], 4294967040 }
 0x27b   :  { %365 = vsyncpa [#allocation3], 1 }
 0x27c   :  { %366 = vsyncpa [#allocation4], 1 }

</bundles_post_ra>
